<compile_context>
chip_gen: v7x
topology: tpu7x:2x2x1
jax: 0.10.0
libtpu: 0.0.40
codegen_flags: <defaults>
</compile_context>

<pallas_src>
import functools

import jax
import jax.numpy as jnp
from jax.experimental import pallas as pl
from jax.experimental.pallas import tpu as pltpu


def _mlp_kernel(x_ref, w1_ref, b1_ref, w2_ref, b2_ref, w3_ref, b3_ref, o_ref):
    tb = x_ref.shape[0]
    # Cast the f32 x tile to bf16 in-kernel (VPU slack; avoids a wrapper pass).
    x = x_ref[...].astype(jnp.bfloat16)                         # (tb, 56)
    # Layer 1: (tb,56)bf16 @ (56,128)bf16 -> f32 acc, +bias, ReLU.
    h1 = jnp.dot(x, w1_ref[...], preferred_element_type=jnp.float32)
    h1 = jnp.maximum(h1 + b1_ref[...], 0.0)                     # (tb, 128) f32
    # Layer 2: (tb,128)bf16 @ (128,64)bf16 -> f32 acc, +bias, ReLU.
    h2 = jnp.dot(h1.astype(w2_ref.dtype), w2_ref[...],
                 preferred_element_type=jnp.float32)
    h2 = jnp.maximum(h2 + b2_ref[...], 0.0)                     # (tb, 64) f32
    # Layer 3: per-row dot with w3 as VPU multiply + XLU lane reduce, reduced
    # directly into the lane-dense (tb/128, 128) output layout so the
    # sublane->lane relayout is folded into the reduction.
    prod = h2 * w3_ref[...].astype(jnp.float32)                 # (tb, 64)
    logits = jnp.sum(prod.reshape(tb // 128, 128, 64), axis=-1) + b3_ref[0, 0]
    o_ref[...] = logits.astype(o_ref.dtype)                     # (tb/128, 128)


def _round_up(a, m):
    return (a + m - 1) // m * m


@functools.partial(jax.jit, static_argnames=("tile_b",))
def mlp_forward(x, params, *, tile_b=8192):
    """x: (B, ...) with prod(...) == 56. Returns (B, 1) f32 logits."""
    B = x.shape[0]
    x2d = x.reshape(B, -1).astype(jnp.float32)
    assert x2d.shape[1] == 56, f"expected 56 features, got {x2d.shape[1]}"
    w1, b1, w2, b2, w3, b3 = params

    # Tiny params (~30 KB total): bf16 matmul weights, f32 biases.
    w1b = w1.astype(jnp.bfloat16)
    w2b = w2.astype(jnp.bfloat16)
    w3t = w3.reshape(1, 64).astype(jnp.bfloat16)
    b1f = b1.reshape(1, 128).astype(jnp.float32)
    b2f = b2.reshape(1, 64).astype(jnp.float32)
    b3s = b3.reshape(1, 1).astype(jnp.float32)

    # Tile selection.  The lane-dense output block is (tb/128, 128), so tb must
    # be a multiple of 128; for multi-step grids its sublane dim (tb/128) must
    # also be a multiple of 8 => tb multiple of 1024.  When the padded batch
    # allows >= 2 steps we cap the tile at half the batch so both v7x
    # TensorCores get work under dimension_semantics=("parallel",).
    B128 = _round_up(B, 128)
    tile_b = max(1024, _round_up(tile_b, 1024))
    if B128 < 2 * 1024:
        tb = B128                                    # single grid step
    else:
        tb = min(tile_b, (B128 // 2) // 1024 * 1024)  # >= 2 grid steps
    Bp = _round_up(B, tb)
    if Bp != B:
        # Padded rows produce bias-only logits and are sliced away below.
        x2d = jnp.pad(x2d, ((0, Bp - B), (0, 0)))
    grid = (Bp // tb,)

    flops = 2 * Bp * (56 * 128 + 128 * 64 + 64)
    bytes_accessed = (Bp * 56 * 4 + Bp * 4                    # x in (f32), out (f32)
                      + (w1b.size + w2b.size + w3t.size) * 2
                      + (b1f.size + b2f.size + b3s.size) * 4)

    out = pl.pallas_call(
        _mlp_kernel,
        out_shape=jax.ShapeDtypeStruct((Bp // 128, 128), jnp.float32),
        grid=grid,
        in_specs=[
            pl.BlockSpec((tb, 56), lambda i: (i, 0)),            # x tile (pipelined)
            pl.BlockSpec((56, 128), lambda i: (0, 0)),           # w1 (resident)
            pl.BlockSpec((1, 128), lambda i: (0, 0)),            # b1
            pl.BlockSpec((128, 64), lambda i: (0, 0)),           # w2
            pl.BlockSpec((1, 64), lambda i: (0, 0)),             # b2
            pl.BlockSpec((1, 64), lambda i: (0, 0)),             # w3 (row vector)
            pl.BlockSpec(memory_space=pltpu.MemorySpace.SMEM),   # b3 scalar
        ],
        out_specs=pl.BlockSpec((tb // 128, 128), lambda i: (i, 0)),
        compiler_params=pltpu.CompilerParams(
            dimension_semantics=("parallel",),
            vmem_limit_bytes=48 * 1024 * 1024),
        cost_estimate=pl.CostEstimate(
            flops=flops, bytes_accessed=bytes_accessed, transcendentals=0),
    )(x2d, w1b, b1f, w2b, b2f, w3t, b3s)

    # (Bp/128, 128) row-major is already batch order: metadata-only reshape.
    return out.reshape(Bp, 1)[:B]


def init_params(key):
    """nn.Linear-style init (uniform +-1/sqrt(fan_in)); weights stored as
    (in_features, out_features)."""
    dims = [(56, 128), (128, 64), (64, 1)]
    params = []
    for fan_in, fan_out in dims:
        key, kw, kb = jax.random.split(key, 3)
        bound = 1.0 / jnp.sqrt(jnp.float32(fan_in))
        w = jax.random.uniform(kw, (fan_in, fan_out), jnp.float32, -bound, bound)
        b = jax.random.uniform(kb, (1, fan_out), jnp.float32, -bound, bound)
        params += [w, b]
    return tuple(params)


def reference_forward(x, params):
    """Pure f32 XLA reference (matches the PyTorch module)."""
    B = x.shape[0]
    x2d = x.reshape(B, -1).astype(jnp.float32)
    w1, b1, w2, b2, w3, b3 = params
    h = jnp.maximum(x2d @ w1 + b1, 0.0)
    h = jnp.maximum(h @ w2 + b2, 0.0)
    return h @ w3 + b3


if __name__ == "__main__":
    key = jax.random.PRNGKey(0)
    kx1, kx2, kp = jax.random.split(key, 3)
    params = init_params(kp)

    # Test 1: small batch -> single grid step. (B, 7, 8) flattens to 56 features.
    x1 = jax.random.normal(kx1, (8, 7, 8), jnp.float32)
    out1 = jax.block_until_ready(mlp_forward(x1, params))
    ref1 = reference_forward(x1, params)
    assert out1.shape == (8, 1)
    assert jnp.allclose(out1, ref1, atol=2e-2, rtol=2e-2), \
        f"max err {jnp.max(jnp.abs(out1 - ref1))}"

    # Test 2: batch large enough for a multi-step "parallel" grid plus padding
    # (B=2500 -> padded 3072, tb=1024, grid=(3,)).
    x2 = jax.random.normal(kx2, (2500, 7, 8), jnp.float32)
    out2 = jax.block_until_ready(mlp_forward(x2, params))
    ref2 = reference_forward(x2, params)
    assert out2.shape == (2500, 1)
    assert jnp.allclose(out2, ref2, atol=2e-2, rtol=2e-2), \
        f"max err {jnp.max(jnp.abs(out2 - ref2))}"

    print("KERNEL_OK")
</pallas_src>

<mosaic_0001>
module attributes {stable_mosaic.version = 11 : i64} {
  func.func @_mlp_kernel(%arg0: i32, %arg1: memref<128x56xf32, #tpu.memory_space<vmem>>, %arg2: memref<56x128xbf16, #tpu.memory_space<vmem>>, %arg3: memref<1x128xf32, #tpu.memory_space<vmem>>, %arg4: memref<128x64xbf16, #tpu.memory_space<vmem>>, %arg5: memref<1x64xf32, #tpu.memory_space<vmem>>, %arg6: memref<1x64xbf16, #tpu.memory_space<vmem>>, %arg7: memref<1x1xf32, #tpu.memory_space<smem>>, %arg8: memref<1x128xf32, #tpu.memory_space<vmem>>) attributes {dimension_semantics = [#tpu.dimension_semantics<parallel>], iteration_bounds = array<i64: 1>, scalar_prefetch = 0 : i64, scratch_operands = 0 : i64, tpu.core_type = #tpu.core_type<tc>, window_params = [{transform_indices = @transform_0, window_bounds = array<i64: 128, 56>}, {pipeline_mode = #tpu.pipeline_mode<synchronous>, transform_indices = @transform_1, window_bounds = array<i64: 56, 128>}, {pipeline_mode = #tpu.pipeline_mode<synchronous>, transform_indices = @transform_2, window_bounds = array<i64: 1, 128>}, {pipeline_mode = #tpu.pipeline_mode<synchronous>, transform_indices = @transform_3, window_bounds = array<i64: 128, 64>}, {pipeline_mode = #tpu.pipeline_mode<synchronous>, transform_indices = @transform_4, window_bounds = array<i64: 1, 64>}, {pipeline_mode = #tpu.pipeline_mode<synchronous>, transform_indices = @transform_5, window_bounds = array<i64: 1, 64>}, {transform_indices = @transform_6, window_bounds = array<i64: 1, 1>}, {transform_indices = @transform_7, window_bounds = array<i64: 1, 128>}]} {
    %c0 = arith.constant 0 : index
    %c0_0 = arith.constant 0 : index
    %0 = vector.load %arg1[%c0, %c0_0] : memref<128x56xf32, #tpu.memory_space<vmem>>, vector<128x56xf32>
    %1 = arith.truncf %0 : vector<128x56xf32> to vector<128x56xbf16>
    %c0_1 = arith.constant 0 : index
    %c0_2 = arith.constant 0 : index
    %2 = vector.load %arg2[%c0_1, %c0_2] : memref<56x128xbf16, #tpu.memory_space<vmem>>, vector<56x128xbf16>
    %cst = arith.constant dense<0.000000e+00> : vector<128x128xf32>
    %3 = tpu.matmul %1, %2, %cst {dimension_numbers = #tpu.dot_dimension_numbers<[1], [0], [0], [1], [0, 0, 1, 1], [], []>} : vector<128x56xbf16>, vector<56x128xbf16>, vector<128x128xf32> -> vector<128x128xf32>
    %c0_3 = arith.constant 0 : index
    %c0_4 = arith.constant 0 : index
    %4 = vector.load %arg3[%c0_3, %c0_4] : memref<1x128xf32, #tpu.memory_space<vmem>>, vector<1x128xf32>
    %5 = vector.broadcast %4 : vector<1x128xf32> to vector<128x128xf32>
    %6 = arith.addf %3, %5 : vector<128x128xf32>
    %cst_5 = arith.constant 0.000000e+00 : f32
    %7 = vector.broadcast %cst_5 : f32 to vector<128x128xf32>
    %8 = arith.maximumf %6, %7 : vector<128x128xf32>
    %9 = arith.truncf %8 : vector<128x128xf32> to vector<128x128xbf16>
    %c0_6 = arith.constant 0 : index
    %c0_7 = arith.constant 0 : index
    %10 = vector.load %arg4[%c0_6, %c0_7] : memref<128x64xbf16, #tpu.memory_space<vmem>>, vector<128x64xbf16>
    %cst_8 = arith.constant dense<0.000000e+00> : vector<128x64xf32>
    %11 = tpu.matmul %9, %10, %cst_8 {dimension_numbers = #tpu.dot_dimension_numbers<[1], [0], [0], [1], [0, 0, 1, 1], [], []>} : vector<128x128xbf16>, vector<128x64xbf16>, vector<128x64xf32> -> vector<128x64xf32>
    %c0_9 = arith.constant 0 : index
    %c0_10 = arith.constant 0 : index
    %12 = vector.load %arg5[%c0_9, %c0_10] : memref<1x64xf32, #tpu.memory_space<vmem>>, vector<1x64xf32>
    %13 = vector.broadcast %12 : vector<1x64xf32> to vector<128x64xf32>
    %14 = arith.addf %11, %13 : vector<128x64xf32>
    %cst_11 = arith.constant 0.000000e+00 : f32
    %15 = vector.broadcast %cst_11 : f32 to vector<128x64xf32>
    %16 = arith.maximumf %14, %15 : vector<128x64xf32>
    %c0_12 = arith.constant 0 : index
    %c0_13 = arith.constant 0 : index
    %17 = vector.load %arg6[%c0_12, %c0_13] : memref<1x64xbf16, #tpu.memory_space<vmem>>, vector<1x64xbf16>
    %18 = arith.extf %17 : vector<1x64xbf16> to vector<1x64xf32>
    %19 = vector.broadcast %18 : vector<1x64xf32> to vector<128x64xf32>
    %20 = arith.mulf %16, %19 : vector<128x64xf32>
    %21 = vector.shape_cast %20 : vector<128x64xf32> to vector<1x128x64xf32>
    %cst_14 = arith.constant dense<0.000000e+00> : vector<1x128xf32>
    %22 = vector.multi_reduction <add>, %21, %cst_14 [2] : vector<1x128x64xf32> to vector<1x128xf32>
    %c0_15 = arith.constant 0 : index
    %c0_16 = arith.constant 0 : index
    %23 = memref.load %arg7[%c0_15, %c0_16] : memref<1x1xf32, #tpu.memory_space<smem>>
    %24 = vector.broadcast %23 : f32 to vector<1x128xf32>
    %25 = arith.addf %22, %24 : vector<1x128xf32>
    %c0_17 = arith.constant 0 : index
    %c0_18 = arith.constant 0 : index
    %26 = vector.load %arg8[%c0_17, %c0_18] : memref<1x128xf32, #tpu.memory_space<vmem>>, vector<1x128xf32>
    tpu.vector_store %arg8[%c0_17, %c0_18], %25 {strides = array<i32>} : memref<1x128xf32, #tpu.memory_space<vmem>>, vector<1x128xf32>,
    return
  }
  func.func @transform_0(%arg0: i32) -> (i32, i32) {
    %c0_i32 = arith.constant 0 : i32
    %c0_i32_0 = arith.constant 0 : i32
    return %arg0, %c0_i32 : i32, i32
  }
  func.func @transform_1(%arg0: i32) -> (i32, i32) {
    %c0_i32 = arith.constant 0 : i32
    %c0_i32_0 = arith.constant 0 : i32
    %c0_i32_1 = arith.constant 0 : i32
    return %c0_i32, %c0_i32_0 : i32, i32
  }
  func.func @transform_2(%arg0: i32) -> (i32, i32) {
    %c0_i32 = arith.constant 0 : i32
    %c0_i32_0 = arith.constant 0 : i32
    %c0_i32_1 = arith.constant 0 : i32
    return %c0_i32, %c0_i32_0 : i32, i32
  }
  func.func @transform_3(%arg0: i32) -> (i32, i32) {
    %c0_i32 = arith.constant 0 : i32
    %c0_i32_0 = arith.constant 0 : i32
    %c0_i32_1 = arith.constant 0 : i32
    return %c0_i32, %c0_i32_0 : i32, i32
  }
  func.func @transform_4(%arg0: i32) -> (i32, i32) {
    %c0_i32 = arith.constant 0 : i32
    %c0_i32_0 = arith.constant 0 : i32
    %c0_i32_1 = arith.constant 0 : i32
    return %c0_i32, %c0_i32_0 : i32, i32
  }
  func.func @transform_5(%arg0: i32) -> (i32, i32) {
    %c0_i32 = arith.constant 0 : i32
    %c0_i32_0 = arith.constant 0 : i32
    %c0_i32_1 = arith.constant 0 : i32
    return %c0_i32, %c0_i32_0 : i32, i32
  }
  func.func @transform_6(%arg0: i32) -> (i32, i32) {
    %c0_i32 = arith.constant 0 : i32
    %c0_i32_0 = arith.constant 0 : i32
    %c0_i32_1 = arith.constant 0 : i32
    return %c0_i32, %c0_i32_0 : i32, i32
  }
  func.func @transform_7(%arg0: i32) -> (i32, i32) {
    %c0_i32 = arith.constant 0 : i32
    %c0_i32_0 = arith.constant 0 : i32
    return %arg0, %c0_i32 : i32, i32
  }
}

</mosaic_0001>

<bundles_post_ra>
// kernel: mlp_forward.1
= control target key start
LH: loop header
LB: loop body
LE: loop exit
PB: predicated region body
PF: predicated region fallthrough
CT: control target
= control target key end

     0   :  { %vm87_vm0 = vcmask 457728   ;;  %vm112_vm1 = vcmask 1043456   ;;  %vm443_vm2 = vcmask 523264   ;;  %vm537_vm3 = vcmask 130112   ;;  %s1038_s1 = inlined_call_operand.vmem [shape: bf16[56,128], index: 1, kind: input, shape index: {}]   ;;  %s1039_s0 = inlined_call_operand.vmem [shape: f32[128,56], index: 0, kind: input, shape index: {}]   ;;  %s1040_s3 = inlined_call_operand.vmem [shape: bf16[128,64], index: 3, kind: input, shape index: {}]   ;;  %s1041_s2 = inlined_call_operand.vmem [shape: f32[1,128], index: 2, kind: input, shape index: {}]   ;;  %s1042_s5 = inlined_call_operand.vmem [shape: bf16[1,64], index: 5, kind: input, shape index: {}]   ;;  %s1043_s4 = inlined_call_operand.vmem [shape: f32[1,64], index: 4, kind: input, shape index: {}]   ;;  %s1044_s6 = inlined_call_operand.<no memory space> [shape: f32[1,1], index: 6, kind: input, shape index: {}]   ;;  %s1045_s7 = inlined_call_operand.vmem [shape: f32[1,128], index: 7, kind: output, shape index: {}]  }
   0x1   :  { %v766_v0 = vld [vmem:[%s1038_s1] sm:$0xff]   ;;  %v767_v1 = vld [vmem:[%s1038_s1 + $0x8] sm:$0xff]   ;;  %v768_v3 = vld [vmem:[%s1038_s1 + $0x10] sm:$0xff]   ;;  %vm544_vm4 = vcmask 195712   ;;  %vm551_vm5 = vcmask 261312   ;;  %vm558_vm6 = vcmask 326912  }
   0x2   :  { %693 = vmatprep.subr.bf16.mxu0 %v766_v0  ;;  %v28_v2 = vld [vmem:[%s1039_s0] sm:$0xff]  ;;  %v29_v4 = vld [vmem:[%s1039_s0 + $0x8] sm:$0xff]  ;;  %v769_v6 = vld [vmem:[%s1038_s1 + $0x18] ss:$0 sps:$4 sm:$0xff]   ;;  %vm565_vm7 = vcmask 392512   ;;  %vm572_vm8 = vcmask 458112  }
   0x3   :  { %694 = vmatpush3.bf16.msra.mxu0 %v766_v0  ;;  %v44_v5 = vpack.c.bf16 %v29_v4, %v28_v2  ;;  %v30_v7 = vld [vmem:[%s1039_s0 + $0x10] sm:$0xff]  ;;  %v31_v8 = vld [vmem:[%s1039_s0 + $0x18] sm:$0xff]  ;;  %v770_v9 = vld [vmem:[%s1040_s3] sm:$0xff]   ;;  %v114_v12 = vsel %vm112_vm1, %v769_v6, 0  ;;  %vm579_vm9 = vcmask 523712   ;;  %vm586_vm10 = vcmask 589312  }
   0x4   :  { %695 = vmatprep.subr.bf16.mxu0 %v767_v1  ;;  %v32_v10 = vld [vmem:[%s1039_s0 + $0x20] sm:$0xff]  ;;  %v771_v11 = vld [vmem:[%s1040_s3 + $0x8] sm:$0xff]   ;;  %749 = vmatprep.subr.bf16.mxu1 %v770_v9  ;;  %v45_v14 = vpack.c.bf16 %v31_v8, %v30_v7  ;;  %v772_v15 = vld [vmem:[%s1040_s3 + $0x10] sm:$0xff]   ;;  %vm593_vm11 = vcmask 654912   ;;  %vm600_vm12 = vcmask 720512   ;;  %vm607_vm13 = vcmask 786112  }
   0x5   :  { %701 = vmatprep.mubr.msk.bf16.mxu0 %vm87_vm0, %v44_v5  ;;  %v33_v13 = vld [vmem:[%s1039_s0 + $0x28] sm:$0xff]  ;;  %757 = vmatpush3.bf16.msra.mxu1 %v770_v9  ;;  %v34_v17 = vld [vmem:[%s1039_s0 + $0x30] sm:$0xff]  ;;  %v35_v18 = vld [vmem:[%s1039_s0 + $0x38] sm:$0xff]  ;;  %vm614_vm14 = vcmask 851712   ;;  %vm621_vm15 = vcmask 917312  }
   0x6   :  { %750 = vmatprep.subr.bf16.mxu1 %v771_v11  ;;  %v46_v16 = vpack.c.bf16 %v33_v13, %v32_v10  ;;  %v773_v19 = vld [vmem:[%s1040_s3 + $0x18] sm:$0xff]   ;;  %v36_v20 = vld [vmem:[%s1039_s0 + $0x40] sm:$0xff]  ;;  %v37_v21 = vld [vmem:[%s1039_s0 + $0x48] sm:$0xff]  ;;  %v47_v22 = vpack.c.bf16 %v35_v18, %v34_v17 }
   0x7   :  { %696 = vmatpush3.bf16.msra.mxu0 %v767_v1  ;;  %v48_v23 = vpack.c.bf16 %v37_v21, %v36_v20  ;;  %v774_v24 = vld [vmem:[%s1040_s3 + $0x20] sm:$0xff]   ;;  %v38_v25 = vld [vmem:[%s1039_s0 + $0x50] sm:$0xff]  ;;  %v39_v26 = vld [vmem:[%s1039_s0 + $0x58] sm:$0xff] }
   0x8   :  { %697 = vmatprep.subr.bf16.mxu0 %v768_v3  ;;  %v775_v27 = vld [vmem:[%s1040_s3 + $0x28] sm:$0xff]   ;;  %v40_v28 = vld [vmem:[%s1039_s0 + $0x60] sm:$0xff]  ;;  %v49_v30 = vpack.c.bf16 %v39_v26, %v38_v25  ;;  %v42_v32 = vld [vmem:[%s1039_s0 + $0x70] sm:$0xff] }
   0x9   :  { %758 = vmatpush3.bf16.msra.mxu1 %v771_v11  ;;  %v41_v29 = vld [vmem:[%s1039_s0 + $0x68] sm:$0xff]  ;;  %v43_v33 = vld [vmem:[%s1039_s0 + $0x78] sm:$0xff]  ;;  %v776_v35 = vld [vmem:[%s1040_s3 + $0x30] sm:$0xff]  }
   0xa   :  { %751 = vmatprep.subr.bf16.mxu1 %v772_v15  ;;  %v50_v31 = vpack.c.bf16 %v41_v29, %v40_v28  ;;  %v51_v34 = vpack.c.bf16 %v43_v33, %v42_v32  ;;  %v777_v36 = vld [vmem:[%s1040_s3 + $0x38] sm:$0xff]   ;;  %v643_v37 = vld [vmem:[%s1041_s2] ss:$0 sm:$0xff] }
   0xb   :  { %698 = vmatpush3.bf16.msra.mxu0 %v768_v3  ;;  %v421_v32 = vld [vmem:[%s1042_s5] sm:$0x1] }
   0xc   :  { %765 = vmatprep.subr.msk.bf16.mxu0 %vm112_vm1, %v769_v6  ;;  %v422_v33 = vunpack.c.l.bf16 %v421_v32  ;;  %vm635_vm1 = vcmask 1048512  }
   0xd   :  { %759 = vmatpush3.bf16.msra.mxu1 %v772_v15 }
   0xe   :  { %752 = vmatprep.subr.bf16.mxu1 %v773_v19 }
   0xf   :  { %700 = vmatpush3.bf16.msra.mxu0 %v114_v12 }
  0x10   :  { %717 = vmatprep.subr.bf16.mxu0 %v770_v9 }
  0x11   :  { %760 = vmatpush3.bf16.msra.mxu1 %v773_v19 }
  0x12   :  { %702 = vmatmul.mubr.msk.bf16.vlgmr.msra.gmra.mrb[0].mxu0 %vm87_vm0, %v45_v14  ;;  %753 = vmatprep.subr.bf16.mxu1 %v774_v24 }
  0x13   :  { %705 = vmatprep.mubr.msk.bf16.mxu0 %vm87_vm0, %v46_v16  ;;  %718 = vmatpush3.bf16.msra.mxu0 %v770_v9 }
  0x14   :  { %719 = vmatprep.subr.bf16.mxu0 %v771_v11 }
  0x15   :  { %761 = vmatpush3.bf16.msra.mxu1 %v774_v24 }
  0x16   :  { %754 = vmatprep.subr.bf16.mxu1 %v775_v27 }
  0x17   :  { %720 = vmatpush3.bf16.msra.mxu0 %v771_v11 }
  0x18   :  { %721 = vmatprep.subr.bf16.mxu0 %v772_v15 }
  0x19   :  { %762 = vmatpush3.bf16.msra.mxu1 %v775_v27 }
  0x1a   :  { %706 = vmatmul.mubr.msk.bf16.gmra.mrb[4].mxu0 %vm87_vm0, %v47_v22  ;;  %755 = vmatprep.subr.bf16.mxu1 %v776_v35 }
  0x1b   :  { %709 = vmatprep.mubr.msk.bf16.mxu0 %vm87_vm0, %v48_v23  ;;  %722 = vmatpush3.bf16.msra.mxu0 %v772_v15 }
  0x1c   :  { %723 = vmatprep.subr.bf16.mxu0 %v773_v19 }
  0x1d   :  { %763 = vmatpush3.bf16.msra.mxu1 %v776_v35 }
  0x1e   :  { %756 = vmatprep.subr.bf16.mxu1 %v777_v36 }
  0x1f   :  { %724 = vmatpush3.bf16.msra.mxu0 %v773_v19 }
  0x20   :  { %725 = vmatprep.subr.bf16.mxu0 %v774_v24 }
  0x21   :  { %764 = vmatpush3.bf16.msra.mxu1 %v777_v36 }
  0x22   :  { %710 = vmatmul.mubr.msk.bf16.gmra.mrb[8].mxu0 %vm87_vm0, %v49_v30  ;;  %v423_v30 = vlaneseq }
  0x23   :  { %713 = vmatprep.mubr.msk.bf16.mxu0 %vm87_vm0, %v50_v31  ;;  %726 = vmatpush3.bf16.msra.mxu0 %v774_v24 }
  0x24   :  { %727 = vmatprep.subr.bf16.mxu0 %v775_v27  ;;  %v914_v31 = vshrl.u32 %v423_v30, 7 }
  0x27   :  { %728 = vmatpush3.bf16.msra.mxu0 %v775_v27 }
  0x28   :  { %729 = vmatprep.subr.bf16.mxu0 %v776_v35 }
  0x2a   :  { %714 = vmatmul.mubr.msk.bf16.gmra.mrb[12].mxu0 %vm87_vm0, %v51_v34  ;;  %v425_v34 = vsub.s32 0, %v914_v31  ;;  %vm628_vm0 = vcmask 982912  }
  0x2b   :  { %730 = vmatpush3.bf16.msra.mxu0 %v776_v35  ;;  %v923_v35 = vld [vmem:[%s1043_s4] ss:$0 sm:$0xff] }
  0x2c   :  { %731 = vmatprep.subr.bf16.mxu0 %v777_v36 }
  0x2f   :  { %732 = vmatpush3.bf16.msra.mxu0 %v777_v36 }
  0xe5   :  { %v703_v38 = vpop.f32.mrb[0].mxu0 }
  0xe6   :  { %v159_v39 = vadd.f32 %v703_v38, %v643_v37  ;;  %v150_v40 = vpop.f32.mrb[1].mxu0 }
  0xe7   :  { %v151_v41 = vadd.f32 %v643_v37, %v150_v40  ;;  %v704_v42 = vpop.f32.mrb[2].mxu0 }
  0xe8   :  { %v162_v43 = vadd.f32 %v704_v42, %v643_v37  ;;  %v153_v44 = vpop.f32.mrb[3].mxu0  ;;  %v215_v46 = vmax.f32 %v159_v39, 0.0  ;;  %v926_v39 = vrot.slane %v422_v33, %v425_v34 }
  0xe9   :  { %v154_v45 = vadd.f32 %v643_v37, %v153_v44  ;;  %v213_v48 = vmax.f32 %v151_v41, 0.0 }
  0xea   :  { %v216_v47 = vmax.f32 %v162_v43, 0.0 }
  0xeb   :  { %v214_v49 = vmax.f32 %v154_v45, 0.0 }
  0xec   :  { %v230_v50 = vpack.c.bf16 %v216_v47, %v215_v46 }
  0xed   :  { %v229_v51 = vpack.c.bf16 %v214_v49, %v213_v48  ;;  %v707_v52 = vpop.f32.mrb[4].mxu0 }
  0xee   :  { %v175_v53 = vadd.f32 %v707_v52, %v643_v37  ;;  %v166_v54 = vpop.f32.mrb[5].mxu0 }
  0xef   :  { %v167_v55 = vadd.f32 %v643_v37, %v166_v54  ;;  %v708_v56 = vpop.f32.mrb[6].mxu0  ;;  %733 = vmatprep.mubr.bf16.mxu0 %v229_v51 }
  0xf0   :  { %v178_v57 = vadd.f32 %v708_v56, %v643_v37  ;;  %v169_v58 = vpop.f32.mrb[7].mxu0  ;;  %734 = vmatmul.mubr.bf16.vlgmr.msra.gmra.mrb[16].mxu0 %v230_v50  ;;  %v219_v60 = vmax.f32 %v175_v53, 0.0 }
  0xf1   :  { %v170_v59 = vadd.f32 %v643_v37, %v169_v58  ;;  %v217_v62 = vmax.f32 %v167_v55, 0.0 }
  0xf2   :  { %v220_v61 = vmax.f32 %v178_v57, 0.0 }
  0xf3   :  { %v218_v63 = vmax.f32 %v170_v59, 0.0 }
  0xf4   :  { %v232_v0 = vpack.c.bf16 %v220_v61, %v219_v60 }
  0xf5   :  { %v711_v1 = vpop.f32.mrb[8].mxu0  ;;  %v231_v2 = vpack.c.bf16 %v218_v63, %v217_v62 }
  0xf6   :  { %v191_v3 = vadd.f32 %v711_v1, %v643_v37  ;;  %v182_v4 = vpop.f32.mrb[9].mxu0 }
  0xf7   :  { %v183_v5 = vadd.f32 %v643_v37, %v182_v4  ;;  %v712_v6 = vpop.f32.mrb[10].mxu0  ;;  %737 = vmatprep.mubr.bf16.mxu1 %v231_v2 }
  0xf8   :  { %v194_v7 = vadd.f32 %v712_v6, %v643_v37  ;;  %v185_v8 = vpop.f32.mrb[11].mxu0  ;;  %738 = vmatmul.mubr.bf16.vlgmr.msra.gmra.mrb[0].mxu1 %v232_v0  ;;  %v223_v10 = vmax.f32 %v191_v3, 0.0 }
  0xf9   :  { %v186_v9 = vadd.f32 %v643_v37, %v185_v8  ;;  %v221_v12 = vmax.f32 %v183_v5, 0.0 }
  0xfa   :  { %v224_v11 = vmax.f32 %v194_v7, 0.0 }
  0xfb   :  { %v222_v13 = vmax.f32 %v186_v9, 0.0 }
  0xfc   :  { %v234_v14 = vpack.c.bf16 %v224_v11, %v223_v10 }
  0xfd   :  { %v233_v15 = vpack.c.bf16 %v222_v13, %v221_v12  ;;  %v715_v16 = vpop.f32.mrb[12].mxu0 }
  0xfe   :  { %v207_v17 = vadd.f32 %v715_v16, %v643_v37  ;;  %v198_v18 = vpop.f32.mrb[13].mxu0 }
  0xff   :  { %v199_v19 = vadd.f32 %v643_v37, %v198_v18  ;;  %v716_v20 = vpop.f32.mrb[14].mxu0  ;;  %741 = vmatprep.mubr.bf16.mxu1 %v233_v15 }
 0x100   :  { %v210_v21 = vadd.f32 %v716_v20, %v643_v37  ;;  %v201_v22 = vpop.f32.mrb[15].mxu0  ;;  %742 = vmatmul.mubr.bf16.gmra.mrb[4].mxu1 %v234_v14  ;;  %v227_v24 = vmax.f32 %v207_v17, 0.0 }
 0x101   :  { %v202_v23 = vadd.f32 %v643_v37, %v201_v22  ;;  %v225_v26 = vmax.f32 %v199_v19, 0.0 }
 0x102   :  { %v228_v25 = vmax.f32 %v210_v21, 0.0 }
 0x103   :  { %v226_v27 = vmax.f32 %v202_v23, 0.0 }
 0x104   :  { %v236_v28 = vpack.c.bf16 %v228_v25, %v227_v24 }
 0x105   :  { %v235_v29 = vpack.c.bf16 %v226_v27, %v225_v26 }
 0x107   :  { %745 = vmatprep.mubr.bf16.mxu1 %v235_v29 }
 0x108   :  { %746 = vmatmul.mubr.bf16.gmra.mrb[8].mxu1 %v236_v28 }
 0x1c3   :  { %v735_v36 = vpop.f32.mrb[16].mxu0 }
 0x1c4   :  { %v351_v37 = vadd.f32 %v735_v36, %v923_v35  ;;  %v342_v38 = vpop.f32.mrb[17].mxu0 }
 0x1c5   :  { %v343_v40 = vadd.f32 %v923_v35, %v342_v38  ;;  %v736_v41 = vpop.f32.mrb[18].mxu0 }
 0x1c6   :  { %v407_v42 = vmax.f32 %v351_v37, 0.0  ;;  %v354_v43 = vadd.f32 %v736_v41, %v923_v35  ;;  %v345_v44 = vpop.f32.mrb[19].mxu0 }
 0x1c7   :  { %v405_v45 = vmax.f32 %v343_v40, 0.0  ;;  %v346_v46 = vadd.f32 %v923_v35, %v345_v44 }
 0x1c8   :  { %v408_v47 = vmax.f32 %v354_v43, 0.0  ;;  %v429_v48 = vmul.f32 %v926_v39, %v407_v42 }
 0x1c9   :  { %v406_v49 = vmax.f32 %v346_v46, 0.0  ;;  %v427_v50 = vmul.f32 %v926_v39, %v405_v45 }
 0x1ca   :  { %v450_v51 = vsel %vm443_vm2, %v429_v48, 0.0  ;;  %v430_v52 = vmul.f32 %v926_v39, %v408_v47 }
 0x1cb   :  { %v739_v53 = vpop.f32.mrb[0].mxu1  ;;  %451 = vadd.xlane.f32.xlu1 %v450_v51  ;;  %v444_v54 = vsel %vm443_vm2, %v427_v50, 0.0  ;;  %v428_v55 = vmul.f32 %v926_v39, %v406_v49 }
 0x1cc   :  { %v367_v56 = vadd.f32 %v739_v53, %v923_v35  ;;  %v358_v57 = vpop.f32.mrb[1].mxu1  ;;  %445 = vadd.xlane.f32.xlu0 %v444_v54  ;;  %v453_v63 = vsel %vm443_vm2, %v430_v52, 0.0 }
 0x1cd   :  { %v359_v58 = vadd.f32 %v923_v35, %v358_v57  ;;  %v740_v59 = vpop.f32.mrb[2].mxu1  ;;  %v447_v2 = vsel %vm443_vm2, %v428_v55, 0.0 }
 0x1ce   :  { %v411_v60 = vmax.f32 %v367_v56, 0.0  ;;  %v370_v61 = vadd.f32 %v740_v59, %v923_v35  ;;  %v361_v62 = vpop.f32.mrb[3].mxu1  ;;  %v976_v56 = vand.u32 127, %v423_v30 }
 0x1cf   :  { %v409_v0 = vmax.f32 %v359_v58, 0.0  ;;  %v362_v1 = vadd.f32 %v923_v35, %v361_v62  ;;  %454 = vadd.xlane.f32.xlu1 %v453_v63 }
 0x1d0   :  { %v412_v3 = vmax.f32 %v370_v61, 0.0  ;;  %448 = vadd.xlane.f32.xlu0 %v447_v2  ;;  %v433_v4 = vmul.f32 %v926_v39, %v411_v60  ;;  %v532_v58 = vadd.s32 4294967288, %v976_v56  ;;  %v982_v60 = vstv %s1044_s6 }
 0x1d1   :  { %v410_v5 = vmax.f32 %v362_v1, 0.0  ;;  %v431_v9 = vmul.f32 %v926_v39, %v409_v0  ;;  %v530_v62 = vsub.s32 %v976_v56, %v914_v31 }
 0x1d2   :  { %v462_v6 = vsel %vm443_vm2, %v433_v4, 0.0  ;;  %v434_v7 = vmul.f32 %v926_v39, %v412_v3  ;;  %v535_v61 = vsub.s32 %v532_v58, %v914_v31  ;;  %v546_v3 = vadd.s32 4294967272, %v976_v56 }
 0x1d3   :  { %v743_v8 = vpop.f32.mrb[4].mxu1  ;;  %v432_v13 = vmul.f32 %v926_v39, %v410_v5  ;;  %v456_v21 = vsel %vm443_vm2, %v431_v9, 0.0  ;;  %v560_v9 = vadd.s32 4294967256, %v976_v56 }
 0x1d4   :  { %v383_v10 = vadd.f32 %v743_v8, %v923_v35  ;;  %v374_v11 = vpop.f32.mrb[5].mxu1  ;;  %463 = vadd.xlane.f32.xlu0 %v462_v6  ;;  %v465_v12 = vsel %vm443_vm2, %v434_v7, 0.0  ;;  %v553_v6 = vadd.s32 4294967264, %v976_v56 }
 0x1d5   :  { %v375_v14 = vadd.f32 %v923_v35, %v374_v11  ;;  %v744_v15 = vpop.f32.mrb[6].mxu1  ;;  %466 = vadd.xlane.f32.xlu1 %v465_v12  ;;  %v459_v23 = vsel %vm443_vm2, %v432_v13, 0.0  ;;  %v549_v12 = vsub.s32 %v546_v3, %v914_v31 }
 0x1d6   :  { %v415_v16 = vmax.f32 %v383_v10, 0.0  ;;  %v386_v17 = vadd.f32 %v744_v15, %v923_v35  ;;  %v377_v18 = vpop.f32.mrb[7].mxu1  ;;  %v567_v10 = vadd.s32 4294967248, %v976_v56 }
 0x1d7   :  { %v413_v19 = vmax.f32 %v375_v14, 0.0  ;;  %v378_v20 = vadd.f32 %v923_v35, %v377_v18 }
 0x1d8   :  { %v416_v22 = vmax.f32 %v386_v17, 0.0  ;;  %457 = vadd.xlane.f32.xlu0 %v456_v21  ;;  %v437_v24 = vmul.f32 %v926_v39, %v415_v16  ;;  %v556_v16 = vsub.s32 %v553_v6, %v914_v31  ;;  %v574_v17 = vadd.s32 4294967240, %v976_v56 }
 0x1d9   :  { %v414_v25 = vmax.f32 %v378_v20, 0.0  ;;  %460 = vadd.xlane.f32.xlu1 %v459_v23  ;;  %v435_v29 = vmul.f32 %v926_v39, %v413_v19  ;;  %v563_v19 = vsub.s32 %v560_v9, %v914_v31  ;;  %v570_v21 = vsub.s32 %v567_v10, %v914_v31 }
 0x1da   :  { %v474_v26 = vsel %vm443_vm2, %v437_v24, 0.0  ;;  %v438_v27 = vmul.f32 %v926_v39, %v416_v22 }
 0x1db   :  { %v747_v28 = vpop.f32.mrb[8].mxu1  ;;  %v436_v36 = vmul.f32 %v926_v39, %v414_v25  ;;  %v468_v45 = vsel %vm443_vm2, %v435_v29, 0.0  ;;  %v581_v29 = vadd.s32 4294967232, %v976_v56 }
 0x1dc   :  { %v399_v32 = vadd.f32 %v747_v28, %v923_v35  ;;  %v390_v33 = vpop.f32.mrb[9].mxu1  ;;  %475 = vadd.xlane.f32.xlu0 %v474_v26  ;;  %v477_v34 = vsel %vm443_vm2, %v438_v27, 0.0  ;;  %v595_v26 = vadd.s32 4294967216, %v976_v56 }
 0x1dd   :  { %v391_v37 = vadd.f32 %v923_v35, %v390_v33  ;;  %v748_v38 = vpop.f32.mrb[10].mxu1  ;;  %478 = vadd.xlane.f32.xlu1 %v477_v34  ;;  %v471_v46 = vsel %vm443_vm2, %v436_v36, 0.0  ;;  %v602_v36 = vadd.s32 4294967208, %v976_v56 }
 0x1de   :  { %v402_v40 = vadd.f32 %v748_v38, %v923_v35  ;;  %v393_v41 = vpop.f32.mrb[11].mxu1  ;;  %v419_v42 = vmax.f32 %v399_v32, 0.0 }
 0x1df   :  { %v417_v43 = vmax.f32 %v391_v37, 0.0  ;;  %v394_v44 = vadd.f32 %v923_v35, %v393_v41  ;;  %v588_v37 = vadd.s32 4294967224, %v976_v56  ;;  %v577_v41 = vsub.s32 %v574_v17, %v914_v31 }
 0x1e0   :  { %469 = vadd.xlane.f32.xlu0 %v468_v45  ;;  %v420_v47 = vmax.f32 %v402_v40, 0.0  ;;  %v441_v52 = vmul.f32 %v926_v39, %v419_v42  ;;  %v598_v45 = vsub.s32 %v595_v26, %v914_v31 }
 0x1e1   :  { %v418_v48 = vmax.f32 %v394_v44, 0.0  ;;  %472 = vadd.xlane.f32.xlu1 %v471_v46  ;;  %v439_v49 = vmul.f32 %v926_v39, %v417_v43  ;;  %v584_v46 = vsub.s32 %v581_v29, %v914_v31 }
 0x1e2   :  { %v442_v35 = vmul.f32 %v926_v39, %v420_v47  ;;  %v486_v54 = vsel %vm443_vm2, %v441_v52, 0.0  ;;  %v609_v47 = vadd.s32 4294967200, %v976_v56 }
 0x1e3   :  { %v480_v50 = vsel %vm443_vm2, %v439_v49, 0.0  ;;  %v440_v51 = vmul.f32 %v926_v39, %v418_v48  ;;  %v539_v39 = vadd.s32 4294967280, %v976_v56  ;;  %v605_v48 = vsub.s32 %v602_v36, %v914_v31 }
 0x1e4   :  { %481 = vadd.xlane.f32.xlu0 %v480_v50  ;;  %v489_v55 = vsel %vm443_vm2, %v442_v35, 0.0  ;;  %v591_v50 = vsub.s32 %v588_v37, %v914_v31 }
 0x1e5   :  { %v483_v53 = vsel %vm443_vm2, %v440_v51, 0.0  ;;  %v542_v2 = vsub.s32 %v539_v39, %v914_v31  ;;  %v616_v51 = vadd.s32 4294967192, %v976_v56  ;;  %v612_v39 = vsub.s32 %v609_v47, %v914_v31 }
 0x1e6   :  { %484 = vadd.xlane.f32.xlu1 %v483_v53 }
 0x1e8   :  { %487 = vadd.xlane.f32.xlu0 %v486_v54 }
 0x1ea   :  { %490 = vadd.xlane.f32.xlu1 %v489_v55 }
 0x258   :  { %v452_v57 = vpop.xlane.xlu1 %451 }
 0x259   :  { %v446_v59 = vpop.xlane.xlu0 %445  ;;  %v496_v4 = vadd.f32 %v982_v60, %v452_v57 }
 0x25a   :  { %v494_v63 = vadd.f32 %v982_v60, %v446_v59 }
 0x25b   :  { %v543_v15 = vrot.slane %v496_v4, %v542_v2  ;;  %v630_v4 = vadd.s32 4294967176, %v976_v56 }
 0x25c   :  { %v455_v0 = vpop.xlane.xlu1 %454  ;;  %v531_v7 = vrot.slane %v494_v63, %v530_v62 }
 0x25d   :  { %v449_v30 = vpop.xlane.xlu0 %448  ;;  %v497_v13 = vadd.f32 %v982_v60, %v455_v0  ;;  %v619_v0 = vsub.s32 %v616_v51, %v914_v31 }
 0x25e   :  { %v495_v1 = vadd.f32 %v982_v60, %v449_v30 }
 0x25f   :  { %v550_v24 = vrot.slane %v497_v13, %v549_v12 }
 0x260   :  { %v536_v5 = vrot.slane %v495_v1, %v535_v61  ;;  %v623_v61 = vadd.s32 4294967184, %v976_v56  ;;  %v633_v56 = vsub.s32 %v630_v4, %v914_v31 }
 0x261   :  { %v464_v8 = vpop.xlane.xlu0 %463 }
 0x262   :  { %v467_v11 = vpop.xlane.xlu1 %466  ;;  %v538_v14 = vsel %vm537_vm3, %v536_v5, %v531_v7  ;;  %v500_v27 = vadd.f32 %v982_v60, %v464_v8 }
 0x263   :  { %v545_v20 = vsel %vm544_vm4, %v543_v15, %v538_v14  ;;  %v501_v42 = vadd.f32 %v982_v60, %v467_v11  ;;  %v626_v11 = vsub.s32 %v623_v61, %v914_v31 }
 0x264   :  { %v552_v32 = vsel %vm551_vm5, %v550_v24, %v545_v20  ;;  %v571_v44 = vrot.slane %v500_v27, %v570_v21 }
 0x265   :  { %v458_v18 = vpop.xlane.xlu0 %457  ;;  %v578_v55 = vrot.slane %v501_v42, %v577_v41 }
 0x266   :  { %v498_v22 = vadd.f32 %v982_v60, %v458_v18  ;;  %v461_v23 = vpop.xlane.xlu1 %460 }
 0x267   :  { %v499_v25 = vadd.f32 %v982_v60, %v461_v23 }
 0x268   :  { %v557_v28 = vrot.slane %v498_v22, %v556_v16 }
 0x269   :  { %v564_v33 = vrot.slane %v499_v25, %v563_v19  ;;  %v476_v34 = vpop.xlane.xlu0 %475 }
 0x26a   :  { %v559_v38 = vsel %vm558_vm6, %v557_v28, %v552_v32  ;;  %v479_v40 = vpop.xlane.xlu1 %478  ;;  %v504_v53 = vadd.f32 %v982_v60, %v476_v34 }
 0x26b   :  { %v566_v43 = vsel %vm565_vm7, %v564_v33, %v559_v38  ;;  %v505_v57 = vadd.f32 %v982_v60, %v479_v40 }
 0x26c   :  { %v573_v52 = vsel %vm572_vm8, %v571_v44, %v566_v43  ;;  %v599_v1 = vrot.slane %v504_v53, %v598_v45 }
 0x26d   :  { %v470_v49 = vpop.xlane.xlu0 %469  ;;  %v580_v62 = vsel %vm579_vm9, %v578_v55, %v573_v52  ;;  %v606_v5 = vrot.slane %v505_v57, %v605_v48 }
 0x26e   :  { %v502_v35 = vadd.f32 %v982_v60, %v470_v49  ;;  %v473_v54 = vpop.xlane.xlu1 %472 }
 0x26f   :  { %v503_v58 = vadd.f32 %v982_v60, %v473_v54 }
 0x270   :  { %v585_v59 = vrot.slane %v502_v35, %v584_v46 }
 0x271   :  { %v592_v63 = vrot.slane %v503_v58, %v591_v50  ;;  %v482_v30 = vpop.xlane.xlu0 %481 }
 0x272   :  { %v587_v2 = vsel %vm586_vm10, %v585_v59, %v580_v62  ;;  %v506_v3 = vadd.f32 %v982_v60, %v482_v30 }
 0x273   :  { %v594_v6 = vsel %vm593_vm11, %v592_v63, %v587_v2  ;;  %v485_v7 = vpop.xlane.xlu1 %484 }
 0x274   :  { %v601_v8 = vsel %vm600_vm12, %v599_v1, %v594_v6  ;;  %v613_v9 = vrot.slane %v506_v3, %v612_v39  ;;  %v507_v10 = vadd.f32 %v982_v60, %v485_v7 }
 0x275   :  { %v608_v12 = vsel %vm607_vm13, %v606_v5, %v601_v8  ;;  %v488_v13 = vpop.xlane.xlu0 %487 }
 0x276   :  { %v615_v14 = vsel %vm614_vm14, %v613_v9, %v608_v12  ;;  %v620_v15 = vrot.slane %v507_v10, %v619_v0  ;;  %v508_v16 = vadd.f32 %v982_v60, %v488_v13 }
 0x277   :  { %v491_v17 = vpop.xlane.xlu1 %490 }
 0x278   :  { %v622_v18 = vsel %vm621_vm15, %v620_v15, %v615_v14  ;;  %v627_v19 = vrot.slane %v508_v16, %v626_v11  ;;  %v509_v20 = vadd.f32 %v982_v60, %v491_v17 }
 0x27a   :  { %v629_v21 = vsel %vm628_vm0, %v627_v19, %v622_v18  ;;  %v634_v22 = vrot.slane %v509_v20, %v633_v56 }
 0x27c   :  { %v636_v23 = vsel %vm635_vm1, %v634_v22, %v629_v21 }
 0x27d   :  { %638 = vst [vmem:[%s1045_s7] sm:$0x1] %v636_v23 }

</bundles_post_ra>
